<compile_context>
chip_gen: v6e
topology: v6e:2x2x1
jax: 0.10.0
libtpu: 0.0.40
codegen_flags: <defaults>
</compile_context>

<pallas_src>
import jax
import jax.numpy as jnp
from jax.experimental import pallas as pl
from jax.experimental.pallas import tpu as pltpu


def _make_mlp_kernel(num_layers, num_classes):
    """Kernel body: `num_layers` Linear layers (ReLU between them) + argmax."""

    def kernel(*refs):
        # refs = (x, w0, b0, w1, b1, ..., w_{L-1}, b_{L-1}, out)
        x_ref = refs[0]
        out_ref = refs[-1]

        w0 = refs[1][...]                    # (d0, in_dim), compute dtype
        b0 = refs[2][...]                    # (d0, 1), f32
        xv = x_ref[...]                      # (TILE_B, in_dim), f32 native layout
        if xv.dtype != w0.dtype:
            xv = xv.astype(w0.dtype)         # cast right before the MXU only
        # Layer 0 contracts the shared feature axis of W0 (d0, in) and
        # x (TILE_B, in):  h <- W0 @ x^T  ->  (d0, TILE_B), batch on lanes.
        h = jax.lax.dot_general(
            w0, xv, dimension_numbers=(((1,), (1,)), ((), ())),
            preferred_element_type=jnp.float32)
        h = h + b0                           # f32 elementwise (VPU)

        for i in range(1, num_layers):
            h = jnp.maximum(h, 0.0)          # ReLU on the previous hidden layer
            w = refs[1 + 2 * i][...]         # (d_i, d_{i-1}), compute dtype
            b = refs[2 + 2 * i][...]         # (d_i, 1), f32
            lhs = h if h.dtype == w.dtype else h.astype(w.dtype)
            h = jnp.dot(w, lhs, preferred_element_type=jnp.float32)
            h = h + b

        # h: (num_classes, TILE_B) f32 logits.  argmax over the class (sublane)
        # axis with torch's first-maximum tie-break (exact: indices ride in f32,
        # fine for num_classes < 2^24), producing a lane-dense (1, TILE_B) int32
        # result.  The sentinel is clamped so NaN logits can never emit an
        # out-of-range class index.
        cls_idx = jax.lax.broadcasted_iota(jnp.int32, h.shape, 0).astype(jnp.float32)
        cmax = jnp.max(h, axis=0, keepdims=True)                  # (1, TILE_B)
        cand = jnp.where(h == cmax, cls_idx, jnp.float32(num_classes))
        idx = jnp.min(cand, axis=0, keepdims=True)
        out_ref[...] = jnp.minimum(idx, jnp.float32(num_classes - 1)).astype(jnp.int32)

    return kernel


def _vmem_caps():
    """Physical per-core VMEM and the fraction of it we let Mosaic use."""
    try:
        physical = int(pltpu.get_tpu_info().vmem_capacity_bytes)
    except Exception:
        physical = 64 << 20                  # conservative default (= v7x per-TC)
    usable = (physical * 7) // 8             # headroom for Mosaic scratch / sems
    return physical, usable


def _pick_tile_b(batch, in_dim, widths, itemsize, param_bytes, vmem_cap):
    """Batch tile: 128 floor (lane width), up to 2048 when the VMEM cap allows."""
    tile = 2048
    while tile > 128 and batch <= tile // 2:
        tile //= 2
    max_w = max(widths + [in_dim])
    while tile > 128:
        tile_bytes = (2 * in_dim * tile * 4              # double-buffered f32 x tile
                      + 2 * tile * 4                     # double-buffered int32 out tile
                      + 2 * (4 + itemsize) * max_w * tile)   # live activations + cast copy
        if param_bytes + tile_bytes <= vmem_cap:
            break
        tile //= 2
    return tile


def _spec(shape, index_map, pipeline_mode=None):
    if pipeline_mode is None:
        return pl.BlockSpec(shape, index_map)
    return pl.BlockSpec(shape, index_map, pipeline_mode=pipeline_mode)


def mlp_classifier_forward(x, params, *, compute_dtype=jnp.bfloat16, tile_b=None,
                           x_buffers=None):
    """x: (B, input_dim) f32.  params: list of (W (out_d, in_d), b (out_d,)) in
    torch nn.Linear layout.  Returns (B,) int32 predicted classes."""
    batch, in_dim = x.shape
    num_layers = len(params)
    num_classes = params[-1][0].shape[0]
    widths = [w.shape[0] for w, _ in params]

    compute_dtype = jnp.dtype(compute_dtype)
    itemsize = compute_dtype.itemsize
    param_bytes = sum(int(w.size) * itemsize + int(b.size) * 4 for w, b in params)

    _, usable_vmem = _vmem_caps()
    if tile_b is None:
        tile_b = _pick_tile_b(batch, in_dim, widths, itemsize, param_bytes, usable_vmem)
    n_tiles = pl.cdiv(batch, tile_b)
    padded = n_tiles * tile_b

    # x stays in its native (B, in_dim) f32 layout; only zero-pad the batch when
    # the tile does not divide it (no host-side transpose / dtype pass over x).
    x_in = x if padded == batch else jnp.pad(x, ((0, padded - batch), (0, 0)))

    flat_args = [x_in]
    for w, b in params:
        flat_args.append(w.astype(compute_dtype))                  # cast once, on host
        flat_args.append(b.astype(jnp.float32).reshape(w.shape[0], 1))

    flops = 2 * padded * sum(w.shape[0] * w.shape[1] for w, _ in params)
    bytes_accessed = param_bytes + int(x_in.size) * x_in.dtype.itemsize + padded * 4
    kernel = _make_mlp_kernel(num_layers, num_classes)
    max_w = max(widths + [in_dim])

    # TODO(synk): for models whose resident parameters exceed ~50% of per-core
    # VMEM (esp. v7x's 64 MiB), stream weight chunks with pltpu.emit_pipeline /
    # a second grid axis instead of assuming every layer fits VMEM-resident.

    def run(single_buffer_params):
        x_mode = (pl.Buffered(x_buffers)
                  if (single_buffer_params and x_buffers) else None)
        param_mode = pl.Buffered(1) if single_buffer_params else None

        in_specs = [_spec((tile_b, in_dim), lambda i: (i, 0), x_mode)]
        for w, _ in params:
            out_d, in_d = w.shape
            # Constant index_map -> parameters stay VMEM-resident across tiles.
            in_specs.append(_spec((out_d, in_d), lambda i: (0, 0), param_mode))
            in_specs.append(_spec((out_d, 1), lambda i: (0, 0), param_mode))

        param_buffers = 1 if single_buffer_params else 2
        budget = (param_buffers * param_bytes
                  + 2 * in_dim * tile_b * 4
                  + 2 * tile_b * 4
                  + 2 * (4 + itemsize) * max_w * tile_b)
        vmem_limit = int(min(max(2 * budget, 4 << 20), usable_vmem))

        return pl.pallas_call(
            kernel,
            grid=(n_tiles,),
            in_specs=in_specs,
            out_specs=pl.BlockSpec((1, tile_b), lambda i: (0, i)),
            out_shape=jax.ShapeDtypeStruct((1, padded), jnp.int32),
            compiler_params=pltpu.CompilerParams(
                dimension_semantics=("parallel",),   # shards tiles across v7x TCs
                vmem_limit_bytes=vmem_limit),
            cost_estimate=pl.CostEstimate(
                flops=int(flops), transcendentals=0,
                bytes_accessed=int(bytes_accessed)),
        )(*flat_args)

    try:
        out = run(single_buffer_params=True)
    except Exception:
        # Fallback for builds where pipeline_mode=pl.Buffered(...) is rejected:
        # default double-buffered specs (correctness identical).
        out = run(single_buffer_params=False)

    return out[0, :batch]                            # (B,) predicted class indices


def init_params(key, input_dim, hidden_dims, num_classes):
    """Deterministic init mirroring torch nn.Linear shapes: W (out, in), b (out,)."""
    dims = [input_dim] + list(hidden_dims) + [num_classes]
    params = []
    for i in range(len(dims) - 1):
        fan_in, fan_out = dims[i], dims[i + 1]
        key, kw, kb = jax.random.split(key, 3)
        scale = 1.0 / jnp.sqrt(jnp.float32(fan_in))
        w = jax.random.uniform(kw, (fan_out, fan_in), jnp.float32, -scale, scale)
        b = jax.random.uniform(kb, (fan_out,), jnp.float32, -scale, scale)
        params.append((w, b))
    return params


if __name__ == "__main__":
    batch = 8
    input_dim = 32
    hidden_dims = (64, 32)
    num_classes = 16

    key = jax.random.PRNGKey(0)
    key, kx = jax.random.split(key)
    x = jax.random.normal(kx, (batch, input_dim), jnp.float32)
    params = init_params(key, input_dim, hidden_dims, num_classes)

    # f32 path: exact semantics of the torch module -> exact argmax match.
    predicted_f32 = mlp_classifier_forward(x, params, compute_dtype=jnp.float32)
    predicted_f32 = jax.block_until_ready(predicted_f32)

    # Pure-JAX reference of the same forward pass (torch layout: x @ W.T + b).
    h = x
    for i, (w, b) in enumerate(params):
        h = jnp.dot(h, w.T, precision=jax.lax.Precision.HIGHEST) + b
        if i < len(params) - 1:
            h = jnp.maximum(h, 0.0)
    ref = jnp.argmax(h, axis=1).astype(jnp.int32)
    assert jnp.array_equal(predicted_f32, ref), (predicted_f32, ref)

    # Default bf16-MXU fast path (all generations): numerics can differ slightly
    # from the f32 torch reference on near-ties, so just verify it runs.
    predicted_bf16 = mlp_classifier_forward(x, params)
    jax.block_until_ready(predicted_bf16)

    print("KERNEL_OK")
</pallas_src>

<mosaic_0001>
module attributes {stable_mosaic.version = 11 : i64} {
  func.func @kernel(%arg0: i32, %arg1: memref<128x32xf32, #tpu.memory_space<vmem>>, %arg2: memref<64x32xf32, #tpu.memory_space<vmem>>, %arg3: memref<64x1xf32, #tpu.memory_space<vmem>>, %arg4: memref<32x64xf32, #tpu.memory_space<vmem>>, %arg5: memref<32x1xf32, #tpu.memory_space<vmem>>, %arg6: memref<16x32xf32, #tpu.memory_space<vmem>>, %arg7: memref<16x1xf32, #tpu.memory_space<vmem>>, %arg8: memref<1x128xi32, #tpu.memory_space<vmem>>) attributes {dimension_semantics = [#tpu.dimension_semantics<parallel>], iteration_bounds = array<i64: 1>, scalar_prefetch = 0 : i64, scratch_operands = 0 : i64, tpu.core_type = #tpu.core_type<tc>, window_params = [{transform_indices = @transform_0, window_bounds = array<i64: 128, 32>}, {pipeline_mode = #tpu.pipeline_mode<synchronous>, transform_indices = @transform_1, window_bounds = array<i64: 64, 32>}, {pipeline_mode = #tpu.pipeline_mode<synchronous>, transform_indices = @transform_2, window_bounds = array<i64: 64, 1>}, {pipeline_mode = #tpu.pipeline_mode<synchronous>, transform_indices = @transform_3, window_bounds = array<i64: 32, 64>}, {pipeline_mode = #tpu.pipeline_mode<synchronous>, transform_indices = @transform_4, window_bounds = array<i64: 32, 1>}, {pipeline_mode = #tpu.pipeline_mode<synchronous>, transform_indices = @transform_5, window_bounds = array<i64: 16, 32>}, {pipeline_mode = #tpu.pipeline_mode<synchronous>, transform_indices = @transform_6, window_bounds = array<i64: 16, 1>}, {transform_indices = @transform_7, window_bounds = array<i64: 1, 128>}]} {
    %c0 = arith.constant 0 : index
    %c0_0 = arith.constant 0 : index
    %0 = vector.load %arg2[%c0, %c0_0] : memref<64x32xf32, #tpu.memory_space<vmem>>, vector<64x32xf32>
    %c0_1 = arith.constant 0 : index
    %c0_2 = arith.constant 0 : index
    %1 = vector.load %arg3[%c0_1, %c0_2] : memref<64x1xf32, #tpu.memory_space<vmem>>, vector<64x1xf32>
    %c0_3 = arith.constant 0 : index
    %c0_4 = arith.constant 0 : index
    %2 = vector.load %arg1[%c0_3, %c0_4] : memref<128x32xf32, #tpu.memory_space<vmem>>, vector<128x32xf32>
    %cst = arith.constant dense<0.000000e+00> : vector<64x128xf32>
    %3 = tpu.matmul %0, %2, %cst {dimension_numbers = #tpu.dot_dimension_numbers<[1], [1], [0], [0], [0, 0, 1, 0], [], []>} : vector<64x32xf32>, vector<128x32xf32>, vector<64x128xf32> -> vector<64x128xf32>
    %4 = vector.broadcast %1 : vector<64x1xf32> to vector<64x128xf32>
    %5 = arith.addf %3, %4 : vector<64x128xf32>
    %cst_5 = arith.constant 0.000000e+00 : f32
    %6 = vector.broadcast %cst_5 : f32 to vector<64x128xf32>
    %7 = arith.maximumf %5, %6 : vector<64x128xf32>
    %c0_6 = arith.constant 0 : index
    %c0_7 = arith.constant 0 : index
    %8 = vector.load %arg4[%c0_6, %c0_7] : memref<32x64xf32, #tpu.memory_space<vmem>>, vector<32x64xf32>
    %c0_8 = arith.constant 0 : index
    %c0_9 = arith.constant 0 : index
    %9 = vector.load %arg5[%c0_8, %c0_9] : memref<32x1xf32, #tpu.memory_space<vmem>>, vector<32x1xf32>
    %cst_10 = arith.constant dense<0.000000e+00> : vector<32x128xf32>
    %10 = tpu.matmul %8, %7, %cst_10 {dimension_numbers = #tpu.dot_dimension_numbers<[1], [0], [0], [1], [0, 0, 1, 1], [], []>} : vector<32x64xf32>, vector<64x128xf32>, vector<32x128xf32> -> vector<32x128xf32>
    %11 = vector.broadcast %9 : vector<32x1xf32> to vector<32x128xf32>
    %12 = arith.addf %10, %11 : vector<32x128xf32>
    %cst_11 = arith.constant 0.000000e+00 : f32
    %13 = vector.broadcast %cst_11 : f32 to vector<32x128xf32>
    %14 = arith.maximumf %12, %13 : vector<32x128xf32>
    %c0_12 = arith.constant 0 : index
    %c0_13 = arith.constant 0 : index
    %15 = vector.load %arg6[%c0_12, %c0_13] : memref<16x32xf32, #tpu.memory_space<vmem>>, vector<16x32xf32>
    %c0_14 = arith.constant 0 : index
    %c0_15 = arith.constant 0 : index
    %16 = vector.load %arg7[%c0_14, %c0_15] : memref<16x1xf32, #tpu.memory_space<vmem>>, vector<16x1xf32>
    %cst_16 = arith.constant dense<0.000000e+00> : vector<16x128xf32>
    %17 = tpu.matmul %15, %14, %cst_16 {dimension_numbers = #tpu.dot_dimension_numbers<[1], [0], [0], [1], [0, 0, 1, 1], [], []>} : vector<16x32xf32>, vector<32x128xf32>, vector<16x128xf32> -> vector<16x128xf32>
    %18 = vector.broadcast %16 : vector<16x1xf32> to vector<16x128xf32>
    %19 = arith.addf %17, %18 : vector<16x128xf32>
    %20 = tpu.iota {dimensions = array<i32: 0>} : vector<16x128xi32>
    %21 = arith.sitofp %20 : vector<16x128xi32> to vector<16x128xf32>
    %cst_17 = arith.constant dense<0xFF800000> : vector<128xf32>
    %22 = vector.multi_reduction <maximumf>, %19, %cst_17 [0] : vector<16x128xf32> to vector<128xf32>
    %23 = vector.shape_cast %22 : vector<128xf32> to vector<1x128xf32>
    %24 = vector.broadcast %23 : vector<1x128xf32> to vector<16x128xf32>
    %25 = arith.cmpf oeq, %19, %24 : vector<16x128xf32>
    %cst_18 = arith.constant 1.600000e+01 : f32
    %26 = vector.broadcast %cst_18 : f32 to vector<16x128xf32>
    %27 = arith.select %25, %21, %26 : vector<16x128xi1>, vector<16x128xf32>
    %cst_19 = arith.constant dense<0x7F800000> : vector<128xf32>
    %28 = vector.multi_reduction <minimumf>, %27, %cst_19 [0] : vector<16x128xf32> to vector<128xf32>
    %29 = vector.shape_cast %28 : vector<128xf32> to vector<1x128xf32>
    %cst_20 = arith.constant 1.500000e+01 : f32
    %30 = vector.broadcast %cst_20 : f32 to vector<1x128xf32>
    %31 = arith.minimumf %29, %30 : vector<1x128xf32>
    %32 = arith.fptosi %31 : vector<1x128xf32> to vector<1x128xi32>
    %c0_21 = arith.constant 0 : index
    %c0_22 = arith.constant 0 : index
    %33 = vector.load %arg8[%c0_21, %c0_22] : memref<1x128xi32, #tpu.memory_space<vmem>>, vector<1x128xi32>
    tpu.vector_store %arg8[%c0_21, %c0_22], %32 {strides = array<i32>} : memref<1x128xi32, #tpu.memory_space<vmem>>, vector<1x128xi32>,
    return
  }
  func.func @transform_0(%arg0: i32) -> (i32, i32) {
    %c0_i32 = arith.constant 0 : i32
    %c0_i32_0 = arith.constant 0 : i32
    return %arg0, %c0_i32 : i32, i32
  }
  func.func @transform_1(%arg0: i32) -> (i32, i32) {
    %c0_i32 = arith.constant 0 : i32
    %c0_i32_0 = arith.constant 0 : i32
    %c0_i32_1 = arith.constant 0 : i32
    return %c0_i32, %c0_i32_0 : i32, i32
  }
  func.func @transform_2(%arg0: i32) -> (i32, i32) {
    %c0_i32 = arith.constant 0 : i32
    %c0_i32_0 = arith.constant 0 : i32
    %c0_i32_1 = arith.constant 0 : i32
    return %c0_i32, %c0_i32_0 : i32, i32
  }
  func.func @transform_3(%arg0: i32) -> (i32, i32) {
    %c0_i32 = arith.constant 0 : i32
    %c0_i32_0 = arith.constant 0 : i32
    %c0_i32_1 = arith.constant 0 : i32
    return %c0_i32, %c0_i32_0 : i32, i32
  }
  func.func @transform_4(%arg0: i32) -> (i32, i32) {
    %c0_i32 = arith.constant 0 : i32
    %c0_i32_0 = arith.constant 0 : i32
    %c0_i32_1 = arith.constant 0 : i32
    return %c0_i32, %c0_i32_0 : i32, i32
  }
  func.func @transform_5(%arg0: i32) -> (i32, i32) {
    %c0_i32 = arith.constant 0 : i32
    %c0_i32_0 = arith.constant 0 : i32
    %c0_i32_1 = arith.constant 0 : i32
    return %c0_i32, %c0_i32_0 : i32, i32
  }
  func.func @transform_6(%arg0: i32) -> (i32, i32) {
    %c0_i32 = arith.constant 0 : i32
    %c0_i32_0 = arith.constant 0 : i32
    %c0_i32_1 = arith.constant 0 : i32
    return %c0_i32, %c0_i32_0 : i32, i32
  }
  func.func @transform_7(%arg0: i32) -> (i32, i32) {
    %c0_i32 = arith.constant 0 : i32
    %c0_i32_0 = arith.constant 0 : i32
    return %c0_i32, %arg0 : i32, i32
  }
}

module attributes {stable_mosaic.version = 11 : i64} {
  func.func @kernel(%arg0: i32, %arg1: memref<128x32xf32, #tpu.memory_space<vmem>>, %arg2: memref<64x32xf32, #tpu.memory_space<vmem>>, %arg3: memref<64x1xf32, #tpu.memory_space<vmem>>, %arg4: memref<32x64xf32, #tpu.memory_space<vmem>>, %arg5: memref<32x1xf32, #tpu.memory_space<vmem>>, %arg6: memref<16x32xf32, #tpu.memory_space<vmem>>, %arg7: memref<16x1xf32, #tpu.memory_space<vmem>>, %arg8: memref<1x128xi32, #tpu.memory_space<vmem>>) attributes {dimension_semantics = [#tpu.dimension_semantics<parallel>], iteration_bounds = array<i64: 1>, scalar_prefetch = 0 : i64, scratch_operands = 0 : i64, tpu.core_type = #tpu.core_type<tc>, window_params = [{transform_indices = @transform_0, window_bounds = array<i64: 128, 32>}, {pipeline_mode = #tpu.pipeline_mode<synchronous>, transform_indices = @transform_1, window_bounds = array<i64: 64, 32>}, {pipeline_mode = #tpu.pipeline_mode<synchronous>, transform_indices = @transform_2, window_bounds = array<i64: 64, 1>}, {pipeline_mode = #tpu.pipeline_mode<synchronous>, transform_indices = @transform_3, window_bounds = array<i64: 32, 64>}, {pipeline_mode = #tpu.pipeline_mode<synchronous>, transform_indices = @transform_4, window_bounds = array<i64: 32, 1>}, {pipeline_mode = #tpu.pipeline_mode<synchronous>, transform_indices = @transform_5, window_bounds = array<i64: 16, 32>}, {pipeline_mode = #tpu.pipeline_mode<synchronous>, transform_indices = @transform_6, window_bounds = array<i64: 16, 1>}, {transform_indices = @transform_7, window_bounds = array<i64: 1, 128>}]} {
    %c0 = arith.constant 0 : index
    %c0_0 = arith.constant 0 : index
    %0 = vector.load %arg2[%c0, %c0_0] : memref<64x32xf32, #tpu.memory_space<vmem>>, vector<64x32xf32>
    %c0_1 = arith.constant 0 : index
    %c0_2 = arith.constant 0 : index
    %1 = vector.load %arg3[%c0_1, %c0_2] : memref<64x1xf32, #tpu.memory_space<vmem>>, vector<64x1xf32>
    %c0_3 = arith.constant 0 : index
    %c0_4 = arith.constant 0 : index
    %2 = vector.load %arg1[%c0_3, %c0_4] : memref<128x32xf32, #tpu.memory_space<vmem>>, vector<128x32xf32>
    %cst = arith.constant dense<0.000000e+00> : vector<64x128xf32>
    %3 = tpu.matmul %0, %2, %cst {dimension_numbers = #tpu.dot_dimension_numbers<[1], [1], [0], [0], [0, 0, 1, 0], [], []>} : vector<64x32xf32>, vector<128x32xf32>, vector<64x128xf32> -> vector<64x128xf32>
    %4 = vector.broadcast %1 : vector<64x1xf32> to vector<64x128xf32>
    %5 = arith.addf %3, %4 : vector<64x128xf32>
    %cst_5 = arith.constant 0.000000e+00 : f32
    %6 = vector.broadcast %cst_5 : f32 to vector<64x128xf32>
    %7 = arith.maximumf %5, %6 : vector<64x128xf32>
    %c0_6 = arith.constant 0 : index
    %c0_7 = arith.constant 0 : index
    %8 = vector.load %arg4[%c0_6, %c0_7] : memref<32x64xf32, #tpu.memory_space<vmem>>, vector<32x64xf32>
    %c0_8 = arith.constant 0 : index
    %c0_9 = arith.constant 0 : index
    %9 = vector.load %arg5[%c0_8, %c0_9] : memref<32x1xf32, #tpu.memory_space<vmem>>, vector<32x1xf32>
    %cst_10 = arith.constant dense<0.000000e+00> : vector<32x128xf32>
    %10 = tpu.matmul %8, %7, %cst_10 {dimension_numbers = #tpu.dot_dimension_numbers<[1], [0], [0], [1], [0, 0, 1, 1], [], []>} : vector<32x64xf32>, vector<64x128xf32>, vector<32x128xf32> -> vector<32x128xf32>
    %11 = vector.broadcast %9 : vector<32x1xf32> to vector<32x128xf32>
    %12 = arith.addf %10, %11 : vector<32x128xf32>
    %cst_11 = arith.constant 0.000000e+00 : f32
    %13 = vector.broadcast %cst_11 : f32 to vector<32x128xf32>
    %14 = arith.maximumf %12, %13 : vector<32x128xf32>
    %c0_12 = arith.constant 0 : index
    %c0_13 = arith.constant 0 : index
    %15 = vector.load %arg6[%c0_12, %c0_13] : memref<16x32xf32, #tpu.memory_space<vmem>>, vector<16x32xf32>
    %c0_14 = arith.constant 0 : index
    %c0_15 = arith.constant 0 : index
    %16 = vector.load %arg7[%c0_14, %c0_15] : memref<16x1xf32, #tpu.memory_space<vmem>>, vector<16x1xf32>
    %cst_16 = arith.constant dense<0.000000e+00> : vector<16x128xf32>
    %17 = tpu.matmul %15, %14, %cst_16 {dimension_numbers = #tpu.dot_dimension_numbers<[1], [0], [0], [1], [0, 0, 1, 1], [], []>} : vector<16x32xf32>, vector<32x128xf32>, vector<16x128xf32> -> vector<16x128xf32>
    %18 = vector.broadcast %16 : vector<16x1xf32> to vector<16x128xf32>
    %19 = arith.addf %17, %18 : vector<16x128xf32>
    %20 = tpu.iota {dimensions = array<i32: 0>} : vector<16x128xi32>
    %21 = arith.sitofp %20 : vector<16x128xi32> to vector<16x128xf32>
    %cst_17 = arith.constant dense<0xFF800000> : vector<128xf32>
    %22 = vector.multi_reduction <maximumf>, %19, %cst_17 [0] : vector<16x128xf32> to vector<128xf32>
    %23 = vector.shape_cast %22 : vector<128xf32> to vector<1x128xf32>
    %24 = vector.broadcast %23 : vector<1x128xf32> to vector<16x128xf32>
    %25 = arith.cmpf oeq, %19, %24 : vector<16x128xf32>
    %cst_18 = arith.constant 1.600000e+01 : f32
    %26 = vector.broadcast %cst_18 : f32 to vector<16x128xf32>
    %27 = arith.select %25, %21, %26 : vector<16x128xi1>, vector<16x128xf32>
    %cst_19 = arith.constant dense<0x7F800000> : vector<128xf32>
    %28 = vector.multi_reduction <minimumf>, %27, %cst_19 [0] : vector<16x128xf32> to vector<128xf32>
    %29 = vector.shape_cast %28 : vector<128xf32> to vector<1x128xf32>
    %cst_20 = arith.constant 1.500000e+01 : f32
    %30 = vector.broadcast %cst_20 : f32 to vector<1x128xf32>
    %31 = arith.minimumf %29, %30 : vector<1x128xf32>
    %32 = arith.fptosi %31 : vector<1x128xf32> to vector<1x128xi32>
    %c0_21 = arith.constant 0 : index
    %c0_22 = arith.constant 0 : index
    %33 = vector.load %arg8[%c0_21, %c0_22] : memref<1x128xi32, #tpu.memory_space<vmem>>, vector<1x128xi32>
    tpu.vector_store %arg8[%c0_21, %c0_22], %32 {strides = array<i32>} : memref<1x128xi32, #tpu.memory_space<vmem>>, vector<1x128xi32>,
    return
  }
  func.func @transform_0(%arg0: i32) -> (i32, i32) {
    %c0_i32 = arith.constant 0 : i32
    %c0_i32_0 = arith.constant 0 : i32
    return %arg0, %c0_i32 : i32, i32
  }
  func.func @transform_1(%arg0: i32) -> (i32, i32) {
    %c0_i32 = arith.constant 0 : i32
    %c0_i32_0 = arith.constant 0 : i32
    %c0_i32_1 = arith.constant 0 : i32
    return %c0_i32, %c0_i32_0 : i32, i32
  }
  func.func @transform_2(%arg0: i32) -> (i32, i32) {
    %c0_i32 = arith.constant 0 : i32
    %c0_i32_0 = arith.constant 0 : i32
    %c0_i32_1 = arith.constant 0 : i32
    return %c0_i32, %c0_i32_0 : i32, i32
  }
  func.func @transform_3(%arg0: i32) -> (i32, i32) {
    %c0_i32 = arith.constant 0 : i32
    %c0_i32_0 = arith.constant 0 : i32
    %c0_i32_1 = arith.constant 0 : i32
    return %c0_i32, %c0_i32_0 : i32, i32
  }
  func.func @transform_4(%arg0: i32) -> (i32, i32) {
    %c0_i32 = arith.constant 0 : i32
    %c0_i32_0 = arith.constant 0 : i32
    %c0_i32_1 = arith.constant 0 : i32
    return %c0_i32, %c0_i32_0 : i32, i32
  }
  func.func @transform_5(%arg0: i32) -> (i32, i32) {
    %c0_i32 = arith.constant 0 : i32
    %c0_i32_0 = arith.constant 0 : i32
    %c0_i32_1 = arith.constant 0 : i32
    return %c0_i32, %c0_i32_0 : i32, i32
  }
  func.func @transform_6(%arg0: i32) -> (i32, i32) {
    %c0_i32 = arith.constant 0 : i32
    %c0_i32_0 = arith.constant 0 : i32
    %c0_i32_1 = arith.constant 0 : i32
    return %c0_i32, %c0_i32_0 : i32, i32
  }
  func.func @transform_7(%arg0: i32) -> (i32, i32) {
    %c0_i32 = arith.constant 0 : i32
    %c0_i32_0 = arith.constant 0 : i32
    return %c0_i32, %arg0 : i32, i32
  }
}

</mosaic_0001>

<bundles_post_ra>
// kernel: tpu_custom_call.1
= control target key start
LH: loop header
LB: loop body
LE: loop exit
PB: predicated region body
PF: predicated region fallthrough
CT: control target
= control target key end

     0   :  { %vm99_vm0 = vcmask 261120   ;;  %v727_v2 = vmov 0   ;;  %s950_s0 = inlined_call_operand.vmem [shape: f32[128,32], index: 0, kind: input, shape index: {}]   ;;  %s951_s1 = inlined_call_operand.vmem [shape: f32[64,32], index: 1, kind: input, shape index: {}]   ;;  %s952_s2 = inlined_call_operand.vmem [shape: f32[64,1], index: 2, kind: input, shape index: {}]   ;;  %s953_s3 = inlined_call_operand.vmem [shape: f32[32,64], index: 3, kind: input, shape index: {}]   ;;  %s954_s4 = inlined_call_operand.vmem [shape: f32[32,1], index: 4, kind: input, shape index: {}]   ;;  %s955_s5 = inlined_call_operand.vmem [shape: f32[16,32], index: 5, kind: input, shape index: {}]   ;;  %s956_s6 = inlined_call_operand.vmem [shape: f32[16,1], index: 6, kind: input, shape index: {}]   ;;  %s957_s7 = inlined_call_operand.hbm [shape: s32[1,128], index: 7, kind: output, shape index: {}]  }
   0x1   :  { %v58_v0 = vld [vmem:[%s950_s0 + $0x78] sm:$0xff]  ;;  %v57_v1 = vld [vmem:[%s950_s0 + $0x70] sm:$0xff]  ;;  %703 = vset.pattern.permute.xlu0 %v727_v2  ;;  %704 = vset.pattern.permute.xlu1 %v727_v2  ;;  %v56_v3 = vld [vmem:[%s950_s0 + $0x68] sm:$0xff] }
   0x2   :  { %622 = vmatprep.subr.msk.mxu0 %vm99_vm0, %v58_v0  ;;  %v27_v4 = vld [vmem:[%s951_s1] sm:$0xff]  ;;  %v42_v6 = vld [vmem:[%s952_s2 + $0x38] sm:$0xff]  ;;  %v40_v7 = vld [vmem:[%s952_s2 + $0x28] sm:$0xff] }
   0x3   :  { %623 = vmatpush3.xpose.msk.msra.mxu0 %vm99_vm0, %v58_v0  ;;  %654 = vmatprep.mubr.msk.f32.mxu0 %vm99_vm0, %v27_v4  ;;  %v55_v5 = vld [vmem:[%s950_s0 + $0x60] sm:$0xff]  ;;  %v41_v8 = vld [vmem:[%s952_s2 + $0x30] sm:$0xff]  ;;  %v54_v10 = vld [vmem:[%s950_s0 + $0x58] sm:$0xff] }
   0x4   :  { %624 = vmatprep.subr.msk.mxu0 %vm99_vm0, %v57_v1  ;;  %96 = vperm.xlu0 %703, %v42_v6   ;;  %v39_v9 = vld [vmem:[%s952_s2 + $0x20] sm:$0xff] }
   0x5   :  { %86 = vperm.xlu1 %704, %v40_v7  }
   0x7   :  { %625 = vmatpush3.xpose.msk.msra.mxu0 %vm99_vm0, %v57_v1 }
   0x8   :  { %626 = vmatprep.subr.msk.mxu0 %vm99_vm0, %v56_v3 }
   0xb   :  { %627 = vmatpush3.xpose.msk.msra.mxu0 %vm99_vm0, %v56_v3 }
   0xc   :  { %628 = vmatprep.subr.msk.mxu0 %vm99_vm0, %v55_v5 }
   0xd   :  { %12 = vsyncpa [#allocation3], 0  ;;  %91 = vperm.xlu0 %703, %v41_v8   ;;  %81 = vperm.xlu1 %704, %v39_v9   ;;  %v38_v11 = vld [vmem:[%s952_s2 + $0x18] sm:$0xff]  ;;  %v37_v12 = vld [vmem:[%s952_s2 + $0x10] sm:$0xff]  ;;  %vm313_vm1 = vcmask 523264  }
   0xe   :  { %v53_v13 = vld [vmem:[%s950_s0 + $0x50] sm:$0xff]  ;;  %v36_v14 = vld [vmem:[%s952_s2 + $0x8] sm:$0xff]  ;;  %v35_v15 = vld [vmem:[%s952_s2] sm:$0xff] }
   0xf   :  { %629 = vmatpush3.xpose.msk.msra.mxu0 %vm99_vm0, %v55_v5  ;;  %v52_v16 = vld [vmem:[%s950_s0 + $0x48] sm:$0xff]  ;;  %v292_v17 = vld [vmem:[%s954_s4 + $0x18] sm:$0xff]  ;;  %v291_v18 = vld [vmem:[%s954_s4 + $0x10] sm:$0xff] }
  0x10   :  { %630 = vmatprep.subr.msk.mxu0 %vm99_vm0, %v54_v10  ;;  %v51_v19 = vld [vmem:[%s950_s0 + $0x40] sm:$0xff]  ;;  %v290_v20 = vld [vmem:[%s954_s4 + $0x8] sm:$0xff]  ;;  %v50_v22 = vld [vmem:[%s950_s0 + $0x38] sm:$0xff] }
  0x11   :  { %76 = vperm.xlu0 %703, %v38_v11   ;;  %71 = vperm.xlu1 %704, %v37_v12   ;;  %v289_v21 = vld [vmem:[%s954_s4] sm:$0xff]  ;;  %v418_v24 = vld [vmem:[%s956_s6 + $0x8] sm:$0xff]  ;;  %v49_v25 = vld [vmem:[%s950_s0 + $0x30] sm:$0xff] }
  0x12   :  { %v417_v23 = vld [vmem:[%s956_s6] sm:$0xff]  ;;  %v48_v26 = vld [vmem:[%s950_s0 + $0x28] sm:$0xff]  ;;  %v46_v28 = vld [vmem:[%s950_s0 + $0x18] sm:$0xff] }
  0x13   :  { %631 = vmatpush3.xpose.msk.msra.mxu0 %vm99_vm0, %v54_v10  ;;  %v47_v27 = vld [vmem:[%s950_s0 + $0x20] sm:$0xff]  ;;  %v45_v29 = vld [vmem:[%s950_s0 + $0x10] sm:$0xff]  ;;  %v44_v30 = vld [vmem:[%s950_s0 + $0x8] sm:$0xff] }
  0x14   :  { %632 = vmatprep.subr.msk.mxu0 %vm99_vm0, %v53_v13  ;;  %v43_v31 = vld [vmem:[%s950_s0] sm:$0xff]  ;;  %v28_v32 = vld [vmem:[%s951_s1 + $0x8] sm:$0xff]  ;;  %v29_v33 = vld [vmem:[%s951_s1 + $0x10] sm:$0xff] }
  0x15   :  { %66 = vperm.xlu0 %703, %v36_v14   ;;  %61 = vperm.xlu1 %704, %v35_v15   ;;  %v30_v34 = vld [vmem:[%s951_s1 + $0x18] sm:$0xff]  ;;  %v31_v35 = vld [vmem:[%s951_s1 + $0x20] sm:$0xff]  ;;  %v32_v36 = vld [vmem:[%s951_s1 + $0x28] sm:$0xff] }
  0x16   :  { %v33_v37 = vld [vmem:[%s951_s1 + $0x30] sm:$0xff]  ;;  %v34_v38 = vld [vmem:[%s951_s1 + $0x38] sm:$0xff]  ;;  %v285_v39 = vld [vmem:[%s953_s3] sm:$0xff] }
  0x17   :  { %633 = vmatpush3.xpose.msk.msra.mxu0 %vm99_vm0, %v53_v13  ;;  %682 = vmatprep.mubr.msk.f32.mxu1 %vm313_vm1, %v285_v39  ;;  %v286_v8 = vld [vmem:[%s953_s3 + $0x8] sm:$0xff]  ;;  %v287_v9 = vld [vmem:[%s953_s3 + $0x10] sm:$0xff]  ;;  %v288_v10 = vld [vmem:[%s953_s3 + $0x18] sm:$0xff] }
  0x18   :  { %634 = vmatprep.subr.msk.mxu0 %vm99_vm0, %v52_v16  ;;  %v415_v11 = vld [vmem:[%s955_s5] sm:$0xff] }
  0x19   :  { %310 = vperm.xlu0 %703, %v292_v17   ;;  %305 = vperm.xlu1 %704, %v291_v18  }
  0x1b   :  { %635 = vmatpush3.xpose.msk.msra.mxu0 %vm99_vm0, %v52_v16 }
  0x1c   :  { %636 = vmatprep.subr.msk.mxu0 %vm99_vm0, %v51_v19 }
  0x1d   :  { %300 = vperm.xlu0 %703, %v290_v20   ;;  %295 = vperm.xlu1 %704, %v289_v21  }
  0x1f   :  { %637 = vmatpush3.xpose.msk.msra.mxu0 %vm99_vm0, %v51_v19 }
  0x20   :  { %638 = vmatprep.subr.msk.mxu0 %vm99_vm0, %v50_v22 }
  0x21   :  { %421 = vperm.xlu0 %703, %v417_v23   ;;  %426 = vperm.xlu1 %704, %v418_v24  }
  0x23   :  { %639 = vmatpush3.xpose.msk.msra.mxu0 %vm99_vm0, %v50_v22 }
  0x24   :  { %640 = vmatprep.subr.msk.mxu0 %vm99_vm0, %v49_v25 }
  0x27   :  { %641 = vmatpush3.xpose.msk.msra.mxu0 %vm99_vm0, %v49_v25 }
  0x28   :  { %642 = vmatprep.subr.msk.mxu0 %vm99_vm0, %v48_v26 }
  0x2b   :  { %643 = vmatpush3.xpose.msk.msra.mxu0 %vm99_vm0, %v48_v26 }
  0x2c   :  { %644 = vmatprep.subr.msk.mxu0 %vm99_vm0, %v47_v27 }
  0x2f   :  { %645 = vmatpush3.xpose.msk.msra.mxu0 %vm99_vm0, %v47_v27 }
  0x30   :  { %646 = vmatprep.subr.msk.mxu0 %vm99_vm0, %v46_v28 }
  0x33   :  { %647 = vmatpush3.xpose.msk.msra.mxu0 %vm99_vm0, %v46_v28  ;;  %v416_v28 = vld [vmem:[%s955_s5 + $0x8] sm:$0xff]  ;;  %s728_s5 = smov [#allocation2]  }
  0x34   :  { %648 = vmatprep.subr.msk.mxu0 %vm99_vm0, %v45_v29  ;;  %s542_s11 = sshll.u32 %s728_s5, 4  ;;  %s543_s11 = int_to_ptr.vmem [resolvable:$true] %s542_s11 }
  0x35   :  { %s705_s12 = scalar_lea.vmem %s543_s11, 16  ;;  %s709_s13 = scalar_lea.vmem %s543_s11, 32 }
  0x36   :  { %p706_p0 = scmp.ne.s32.totalorder %s543_s11, %s705_s12  ;;  %p710_p1 = scmp.lt.s32.totalorder %s543_s11, %s543_s11 }
  0x37   :  { %649 = vmatpush3.xpose.msk.msra.mxu0 %vm99_vm0, %v45_v29  ;;  %p711_p2 = scmp.lt.s32.totalorder %s709_s13, %s705_s12 }
  0x38   :  { %650 = vmatprep.subr.msk.mxu0 %vm99_vm0, %v44_v30 }
  0x39   :  { %p712_p3 = por %p711_p2, %p710_p1 }
  0x3b   :  { %651 = vmatpush3.xpose.msk.msra.mxu0 %vm99_vm0, %v44_v30  ;;  %p713_p4 = pnand %p712_p3, %p706_p0 }
  0x3c   :  { %652 = vmatprep.subr.msk.mxu0 %vm99_vm0, %v43_v31 }
  0x3f   :  { %653 = vmatpush3.xpose.msk.msra.mxu0 %vm99_vm0, %v43_v31 }
  0x42   :  { %655 = vmatmul.mubr.msk.f32.vlgmr.msra.gmra.mxu0 %vm99_vm0, %v28_v32 }
  0x43   :  { %657 = vmatprep.mubr.msk.f32.mxu0 %vm99_vm0, %v29_v33 }
  0x46   :  { %658 = vmatmul.mubr.msk.f32.gmra.mxu0 %vm99_vm0, %v30_v34 }
  0x47   :  { %660 = vmatprep.mubr.msk.f32.mxu0 %vm99_vm0, %v31_v35  ;;  %v510_v35 = vlaneseq }
  0x4a   :  { %661 = vmatmul.mubr.msk.f32.gmra.mxu0 %vm99_vm0, %v32_v36 }
  0x4b   :  { %663 = vmatprep.mubr.msk.f32.mxu0 %vm99_vm0, %v33_v37 }
  0x4e   :  { %664 = vmatmul.mubr.msk.f32.gmra.mxu0 %vm99_vm0, %v34_v38  ;;  %v511_v38 = vshrl.u32 %v510_v35, 7 }
  0x7f   :  { %v97_v42 = vpop.permute.xlu0 %96 }
  0x80   :  { %v87_v43 = vpop.permute.xlu1 %86 }
  0x88   :  { %v92_v47 = vpop.permute.xlu0 %91  ;;  %v82_v48 = vpop.permute.xlu1 %81 }
  0x8c   :  { %v77_v56 = vpop.permute.xlu0 %76  ;;  %v72_v57 = vpop.permute.xlu1 %71 }
  0x90   :  { %v67_v0 = vpop.permute.xlu0 %66  ;;  %v62_v1 = vpop.permute.xlu1 %61 }
  0x94   :  { %v311_v12 = vpop.permute.xlu0 %310  ;;  %v306_v14 = vpop.permute.xlu1 %305 }
  0x98   :  { %v301_v18 = vpop.permute.xlu0 %300  ;;  %v296_v23 = vpop.permute.xlu1 %295 }
  0x9c   :  { %v422_v30 = vpop.permute.xlu0 %421  ;;  %v427_v31 = vpop.permute.xlu1 %426 }
 0x102   :  { %v656_v40 = vpop.f32.mrf.mxu0 }
 0x103   :  { %v244_v2 = vadd.f32 %v656_v40, %v67_v0 }
 0x104   :  { %v238_v41 = vpop.f32.mrf.mxu0 }
 0x105   :  { %v239_v4 = vadd.f32 %v238_v41, %v62_v1  ;;  %v278_v6 = vmax.f32 %v244_v2, 0.0  ;;  %v512_v41 = vadd.s32 8, %v511_v38 }
 0x106   :  { %v659_v44 = vpop.f32.mrf.mxu0 }
 0x107   :  { %v254_v60 = vadd.f32 %v659_v44, %v77_v56  ;;  %v277_v7 = vmax.f32 %v239_v4, 0.0  ;;  %v513_v44 = vcvt.s32.f32 %v511_v38 }
 0x108   :  { %v248_v45 = vpop.f32.mrf.mxu0 }
 0x109   :  { %v249_v62 = vadd.f32 %v248_v45, %v72_v57  ;;  %v280_v3 = vmax.f32 %v254_v60, 0.0  ;;  %v514_v45 = vcvt.s32.f32 %v512_v41 }
 0x10a   :  { %v662_v46 = vpop.f32.mrf.mxu0 }
 0x10b   :  { %v264_v53 = vadd.f32 %v662_v46, %v87_v43  ;;  %v279_v5 = vmax.f32 %v249_v62, 0.0 }
 0x10c   :  { %v258_v49 = vpop.f32.mrf.mxu0 }
 0x10d   :  { %v259_v58 = vadd.f32 %v258_v49, %v82_v48  ;;  %v282_v61 = vmax.f32 %v264_v53, 0.0 }
 0x10e   :  { %v665_v50 = vpop.f32.mrf.mxu0 }
 0x10f   :  { %v274_v51 = vadd.f32 %v665_v50, %v97_v42  ;;  %v281_v63 = vmax.f32 %v259_v58, 0.0 }
 0x110   :  { %v268_v52 = vpop.f32.mrf.mxu0 }
 0x111   :  { %v284_v54 = vmax.f32 %v274_v51, 0.0  ;;  %v269_v55 = vadd.f32 %v268_v52, %v92_v47 }
 0x113   :  { %v283_v59 = vmax.f32 %v269_v55, 0.0  ;;  %666 = vmatprep.subr.mxu1 %v284_v54 }
 0x114   :  { %667 = vmatpush3.msra.mxu1 %v284_v54 }
 0x115   :  { %668 = vmatprep.subr.mxu1 %v283_v59 }
 0x116   :  { %669 = vmatpush3.msra.mxu1 %v283_v59 }
 0x117   :  { %670 = vmatprep.subr.mxu1 %v282_v61 }
 0x118   :  { %671 = vmatpush3.msra.mxu1 %v282_v61 }
 0x119   :  { %672 = vmatprep.subr.mxu1 %v281_v63 }
 0x11a   :  { %673 = vmatpush3.msra.mxu1 %v281_v63 }
 0x11b   :  { %674 = vmatprep.subr.mxu1 %v280_v3 }
 0x11c   :  { %675 = vmatpush3.msra.mxu1 %v280_v3 }
 0x11d   :  { %676 = vmatprep.subr.mxu1 %v279_v5 }
 0x11e   :  { %677 = vmatpush3.msra.mxu1 %v279_v5 }
 0x11f   :  { %678 = vmatprep.subr.mxu1 %v278_v6 }
 0x120   :  { %679 = vmatpush3.msra.mxu1 %v278_v6 }
 0x121   :  { %680 = vmatprep.subr.mxu1 %v277_v7 }
 0x122   :  { %681 = vmatpush3.msra.mxu1 %v277_v7 }
 0x123   :  { %683 = vmatmul.mubr.msk.f32.vlgmr.msra.gmra.mxu1 %vm313_vm1, %v286_v8 }
 0x124   :  { %685 = vmatprep.mubr.msk.f32.mxu1 %vm313_vm1, %v287_v9 }
 0x127   :  { %686 = vmatmul.mubr.msk.f32.gmra.mxu1 %vm313_vm1, %v288_v10 }
 0x128   :  { %696 = vmatprep.mubr.msk.f32.mxu1 %vm99_vm0, %v415_v11 }
 0x1e3   :  { %v684_v13 = vpop.f32.mrf.mxu1 }
 0x1e4   :  { %v398_v20 = vadd.f32 %v684_v13, %v301_v18 }
 0x1e5   :  { %v392_v15 = vpop.f32.mrf.mxu1 }
 0x1e6   :  { %v393_v24 = vadd.f32 %v392_v15, %v296_v23  ;;  %v412_v26 = vmax.f32 %v398_v20, 0.0 }
 0x1e7   :  { %v687_v16 = vpop.f32.mrf.mxu1 }
 0x1e8   :  { %v408_v17 = vadd.f32 %v687_v16, %v311_v12  ;;  %v411_v27 = vmax.f32 %v393_v24, 0.0 }
 0x1e9   :  { %v402_v19 = vpop.f32.mrf.mxu1 }
 0x1ea   :  { %v414_v21 = vmax.f32 %v408_v17, 0.0  ;;  %v403_v22 = vadd.f32 %v402_v19, %v306_v14 }
 0x1ec   :  { %v413_v25 = vmax.f32 %v403_v22, 0.0  ;;  %688 = vmatprep.subr.mxu1 %v414_v21 }
 0x1ed   :  { %689 = vmatpush3.msra.mxu1 %v414_v21 }
 0x1ee   :  { %690 = vmatprep.subr.mxu1 %v413_v25 }
 0x1ef   :  { %691 = vmatpush3.msra.mxu1 %v413_v25 }
 0x1f0   :  { %692 = vmatprep.subr.mxu1 %v412_v26 }
 0x1f1   :  { %693 = vmatpush3.msra.mxu1 %v412_v26 }
 0x1f2   :  { %694 = vmatprep.subr.mxu1 %v411_v27 }
 0x1f3   :  { %695 = vmatpush3.msra.mxu1 %v411_v27 }
 0x1f4   :  { %697 = vmatmul.mubr.msk.f32.vlgmr.msra.gmra.mxu1 %vm99_vm0, %v416_v28 }
 0x2b4   :  { %v698_v29 = vpop.f32.mrf.mxu1 }
 0x2b5   :  { %v507_v33 = vadd.f32 %v698_v29, %v427_v31 }
 0x2b6   :  { %v501_v32 = vpop.f32.mrf.mxu1 }
 0x2b7   :  { %v502_v34 = vadd.f32 %v501_v32, %v422_v30 }
 0x2b9   :  { %v515_v36 = vmax.f32 %v502_v34, %v507_v33 }
 0x2bb   :  { %v516_v37 = vrot.slane %v515_v36, 4 }
 0x2bd   :  { %v517_v39 = vmax.f32 %v515_v36, %v516_v37 }
 0x2bf   :  { %v518_v40 = vrot.slane %v517_v39, 2 }
 0x2c1   :  { %v519_v42 = vmax.f32 %v517_v39, %v518_v40 }
 0x2c3   :  { %v520_v43 = vrot.slane %v519_v42, 1 }
 0x2c5   :  { %v521_v46 = vmax.f32 %v519_v42, %v520_v43 }
 0x2c7   :  { %vm522_vm2 = vcmp.eq.f32.partialorder %v502_v34, %v521_v46  ;;  %vm523_vm3 = vcmp.eq.f32.partialorder %v507_v33, %v521_v46 }
 0x2c8   :  { %v524_v47 = vsel %vm522_vm2, %v513_v44, 16.0  ;;  %v525_v48 = vsel %vm523_vm3, %v514_v45, 16.0 }
 0x2c9   :  { %v526_v49 = vmin.f32 %v524_v47, %v525_v48 }
 0x2cb   :  { %v527_v50 = vrot.slane %v526_v49, 4 }
 0x2cd   :  { %v528_v51 = vmin.f32 %v526_v49, %v527_v50 }
 0x2cf   :  { %v529_v52 = vrot.slane %v528_v51, 2 }
 0x2d1   :  { %v530_v53 = vmin.f32 %v528_v51, %v529_v52 }
 0x2d3   :  { %v531_v54 = vrot.slane %v530_v53, 1 }
 0x2d5   :  { %v532_v55 = vmin.f32 %v530_v53, %v531_v54 }
 0x2d7   :  { %v533_v56 = vmin.f32 %v532_v55, 15.0 }
 0x2d9   :  { %v699_v57 = vtrunc.f32 %v533_v56 }
 0x2db   :  { %v700_v58 = vcvt.f32.s32 %v699_v57 }
 0x2dd   :  { %535 = vst [vmem:[#allocation2] sm:$0x1] %v700_v58 }
 0x2de   :  { %716 = shalt.err (!%p713_p4)
}
 0x2df   :  { %545 = dma.vmem_to_hbm [thread:$0]  %s543_s11, 16, %s957_s7, [#allocation3]  }
 0x2e0   :  { %725 = dma.done.wait [#allocation3], 16  }
 0x2e1   :  { %726 = vsyncadd [#allocation3], 4294967280 }
 0x2e2   :  { %549 = vsyncpa [#allocation3], 1 }

// kernel: tpu_custom_call.1
= control target key start
LH: loop header
LB: loop body
LE: loop exit
PB: predicated region body
PF: predicated region fallthrough
CT: control target
= control target key end

     0   :  { %vm99_vm0 = vcmask 261120   ;;  %v727_v2 = vmov 0   ;;  %s950_s0 = inlined_call_operand.vmem [shape: f32[128,32], index: 0, kind: input, shape index: {}]   ;;  %s951_s1 = inlined_call_operand.vmem [shape: f32[64,32], index: 1, kind: input, shape index: {}]   ;;  %s952_s2 = inlined_call_operand.vmem [shape: f32[64,1], index: 2, kind: input, shape index: {}]   ;;  %s953_s3 = inlined_call_operand.vmem [shape: f32[32,64], index: 3, kind: input, shape index: {}]   ;;  %s954_s4 = inlined_call_operand.vmem [shape: f32[32,1], index: 4, kind: input, shape index: {}]   ;;  %s955_s5 = inlined_call_operand.vmem [shape: f32[16,32], index: 5, kind: input, shape index: {}]   ;;  %s956_s6 = inlined_call_operand.vmem [shape: f32[16,1], index: 6, kind: input, shape index: {}]   ;;  %s957_s7 = inlined_call_operand.hbm [shape: s32[1,128], index: 7, kind: output, shape index: {}]  }
   0x1   :  { %v58_v0 = vld [vmem:[%s950_s0 + $0x78] sm:$0xff]  ;;  %v57_v1 = vld [vmem:[%s950_s0 + $0x70] sm:$0xff]  ;;  %703 = vset.pattern.permute.xlu0 %v727_v2  ;;  %704 = vset.pattern.permute.xlu1 %v727_v2  ;;  %v56_v3 = vld [vmem:[%s950_s0 + $0x68] sm:$0xff] }
   0x2   :  { %622 = vmatprep.subr.msk.mxu0 %vm99_vm0, %v58_v0  ;;  %v27_v4 = vld [vmem:[%s951_s1] sm:$0xff]  ;;  %v42_v6 = vld [vmem:[%s952_s2 + $0x38] sm:$0xff]  ;;  %v40_v7 = vld [vmem:[%s952_s2 + $0x28] sm:$0xff] }
   0x3   :  { %623 = vmatpush3.xpose.msk.msra.mxu0 %vm99_vm0, %v58_v0  ;;  %654 = vmatprep.mubr.msk.f32.mxu0 %vm99_vm0, %v27_v4  ;;  %v55_v5 = vld [vmem:[%s950_s0 + $0x60] sm:$0xff]  ;;  %v41_v8 = vld [vmem:[%s952_s2 + $0x30] sm:$0xff]  ;;  %v54_v10 = vld [vmem:[%s950_s0 + $0x58] sm:$0xff] }
   0x4   :  { %624 = vmatprep.subr.msk.mxu0 %vm99_vm0, %v57_v1  ;;  %96 = vperm.xlu0 %703, %v42_v6   ;;  %v39_v9 = vld [vmem:[%s952_s2 + $0x20] sm:$0xff] }
   0x5   :  { %86 = vperm.xlu1 %704, %v40_v7  }
   0x7   :  { %625 = vmatpush3.xpose.msk.msra.mxu0 %vm99_vm0, %v57_v1 }
   0x8   :  { %626 = vmatprep.subr.msk.mxu0 %vm99_vm0, %v56_v3 }
   0xb   :  { %627 = vmatpush3.xpose.msk.msra.mxu0 %vm99_vm0, %v56_v3 }
   0xc   :  { %628 = vmatprep.subr.msk.mxu0 %vm99_vm0, %v55_v5 }
   0xd   :  { %12 = vsyncpa [#allocation3], 0  ;;  %91 = vperm.xlu0 %703, %v41_v8   ;;  %81 = vperm.xlu1 %704, %v39_v9   ;;  %v38_v11 = vld [vmem:[%s952_s2 + $0x18] sm:$0xff]  ;;  %v37_v12 = vld [vmem:[%s952_s2 + $0x10] sm:$0xff]  ;;  %vm313_vm1 = vcmask 523264  }
   0xe   :  { %v53_v13 = vld [vmem:[%s950_s0 + $0x50] sm:$0xff]  ;;  %v36_v14 = vld [vmem:[%s952_s2 + $0x8] sm:$0xff]  ;;  %v35_v15 = vld [vmem:[%s952_s2] sm:$0xff] }
   0xf   :  { %629 = vmatpush3.xpose.msk.msra.mxu0 %vm99_vm0, %v55_v5  ;;  %v52_v16 = vld [vmem:[%s950_s0 + $0x48] sm:$0xff]  ;;  %v292_v17 = vld [vmem:[%s954_s4 + $0x18] sm:$0xff]  ;;  %v291_v18 = vld [vmem:[%s954_s4 + $0x10] sm:$0xff] }
  0x10   :  { %630 = vmatprep.subr.msk.mxu0 %vm99_vm0, %v54_v10  ;;  %v51_v19 = vld [vmem:[%s950_s0 + $0x40] sm:$0xff]  ;;  %v290_v20 = vld [vmem:[%s954_s4 + $0x8] sm:$0xff]  ;;  %v50_v22 = vld [vmem:[%s950_s0 + $0x38] sm:$0xff] }
  0x11   :  { %76 = vperm.xlu0 %703, %v38_v11   ;;  %71 = vperm.xlu1 %704, %v37_v12   ;;  %v289_v21 = vld [vmem:[%s954_s4] sm:$0xff]  ;;  %v418_v24 = vld [vmem:[%s956_s6 + $0x8] sm:$0xff]  ;;  %v49_v25 = vld [vmem:[%s950_s0 + $0x30] sm:$0xff] }
  0x12   :  { %v417_v23 = vld [vmem:[%s956_s6] sm:$0xff]  ;;  %v48_v26 = vld [vmem:[%s950_s0 + $0x28] sm:$0xff]  ;;  %v46_v28 = vld [vmem:[%s950_s0 + $0x18] sm:$0xff] }
  0x13   :  { %631 = vmatpush3.xpose.msk.msra.mxu0 %vm99_vm0, %v54_v10  ;;  %v47_v27 = vld [vmem:[%s950_s0 + $0x20] sm:$0xff]  ;;  %v45_v29 = vld [vmem:[%s950_s0 + $0x10] sm:$0xff]  ;;  %v44_v30 = vld [vmem:[%s950_s0 + $0x8] sm:$0xff] }
  0x14   :  { %632 = vmatprep.subr.msk.mxu0 %vm99_vm0, %v53_v13  ;;  %v43_v31 = vld [vmem:[%s950_s0] sm:$0xff]  ;;  %v28_v32 = vld [vmem:[%s951_s1 + $0x8] sm:$0xff]  ;;  %v29_v33 = vld [vmem:[%s951_s1 + $0x10] sm:$0xff] }
  0x15   :  { %66 = vperm.xlu0 %703, %v36_v14   ;;  %61 = vperm.xlu1 %704, %v35_v15   ;;  %v30_v34 = vld [vmem:[%s951_s1 + $0x18] sm:$0xff]  ;;  %v31_v35 = vld [vmem:[%s951_s1 + $0x20] sm:$0xff]  ;;  %v32_v36 = vld [vmem:[%s951_s1 + $0x28] sm:$0xff] }
  0x16   :  { %v33_v37 = vld [vmem:[%s951_s1 + $0x30] sm:$0xff]  ;;  %v34_v38 = vld [vmem:[%s951_s1 + $0x38] sm:$0xff]  ;;  %v285_v39 = vld [vmem:[%s953_s3] sm:$0xff] }
  0x17   :  { %633 = vmatpush3.xpose.msk.msra.mxu0 %vm99_vm0, %v53_v13  ;;  %682 = vmatprep.mubr.msk.f32.mxu1 %vm313_vm1, %v285_v39  ;;  %v286_v8 = vld [vmem:[%s953_s3 + $0x8] sm:$0xff]  ;;  %v287_v9 = vld [vmem:[%s953_s3 + $0x10] sm:$0xff]  ;;  %v288_v10 = vld [vmem:[%s953_s3 + $0x18] sm:$0xff] }
  0x18   :  { %634 = vmatprep.subr.msk.mxu0 %vm99_vm0, %v52_v16  ;;  %v415_v11 = vld [vmem:[%s955_s5] sm:$0xff] }
  0x19   :  { %310 = vperm.xlu0 %703, %v292_v17   ;;  %305 = vperm.xlu1 %704, %v291_v18  }
  0x1b   :  { %635 = vmatpush3.xpose.msk.msra.mxu0 %vm99_vm0, %v52_v16 }
  0x1c   :  { %636 = vmatprep.subr.msk.mxu0 %vm99_vm0, %v51_v19 }
  0x1d   :  { %300 = vperm.xlu0 %703, %v290_v20   ;;  %295 = vperm.xlu1 %704, %v289_v21  }
  0x1f   :  { %637 = vmatpush3.xpose.msk.msra.mxu0 %vm99_vm0, %v51_v19 }
  0x20   :  { %638 = vmatprep.subr.msk.mxu0 %vm99_vm0, %v50_v22 }
  0x21   :  { %421 = vperm.xlu0 %703, %v417_v23   ;;  %426 = vperm.xlu1 %704, %v418_v24  }
  0x23   :  { %639 = vmatpush3.xpose.msk.msra.mxu0 %vm99_vm0, %v50_v22 }
  0x24   :  { %640 = vmatprep.subr.msk.mxu0 %vm99_vm0, %v49_v25 }
  0x27   :  { %641 = vmatpush3.xpose.msk.msra.mxu0 %vm99_vm0, %v49_v25 }
  0x28   :  { %642 = vmatprep.subr.msk.mxu0 %vm99_vm0, %v48_v26 }
  0x2b   :  { %643 = vmatpush3.xpose.msk.msra.mxu0 %vm99_vm0, %v48_v26 }
  0x2c   :  { %644 = vmatprep.subr.msk.mxu0 %vm99_vm0, %v47_v27 }
  0x2f   :  { %645 = vmatpush3.xpose.msk.msra.mxu0 %vm99_vm0, %v47_v27 }
  0x30   :  { %646 = vmatprep.subr.msk.mxu0 %vm99_vm0, %v46_v28 }
  0x33   :  { %647 = vmatpush3.xpose.msk.msra.mxu0 %vm99_vm0, %v46_v28  ;;  %v416_v28 = vld [vmem:[%s955_s5 + $0x8] sm:$0xff]  ;;  %s728_s5 = smov [#allocation2]  }
  0x34   :  { %648 = vmatprep.subr.msk.mxu0 %vm99_vm0, %v45_v29  ;;  %s542_s11 = sshll.u32 %s728_s5, 4  ;;  %s543_s11 = int_to_ptr.vmem [resolvable:$true] %s542_s11 }
  0x35   :  { %s705_s12 = scalar_lea.vmem %s543_s11, 16  ;;  %s709_s13 = scalar_lea.vmem %s543_s11, 32 }
  0x36   :  { %p706_p0 = scmp.ne.s32.totalorder %s543_s11, %s705_s12  ;;  %p710_p1 = scmp.lt.s32.totalorder %s543_s11, %s543_s11 }
  0x37   :  { %649 = vmatpush3.xpose.msk.msra.mxu0 %vm99_vm0, %v45_v29  ;;  %p711_p2 = scmp.lt.s32.totalorder %s709_s13, %s705_s12 }
  0x38   :  { %650 = vmatprep.subr.msk.mxu0 %vm99_vm0, %v44_v30 }
  0x39   :  { %p712_p3 = por %p711_p2, %p710_p1 }
  0x3b   :  { %651 = vmatpush3.xpose.msk.msra.mxu0 %vm99_vm0, %v44_v30  ;;  %p713_p4 = pnand %p712_p3, %p706_p0 }
  0x3c   :  { %652 = vmatprep.subr.msk.mxu0 %vm99_vm0, %v43_v31 }
  0x3f   :  { %653 = vmatpush3.xpose.msk.msra.mxu0 %vm99_vm0, %v43_v31 }
  0x42   :  { %655 = vmatmul.mubr.msk.f32.vlgmr.msra.gmra.mxu0 %vm99_vm0, %v28_v32 }
  0x43   :  { %657 = vmatprep.mubr.msk.f32.mxu0 %vm99_vm0, %v29_v33 }
  0x46   :  { %658 = vmatmul.mubr.msk.f32.gmra.mxu0 %vm99_vm0, %v30_v34 }
  0x47   :  { %660 = vmatprep.mubr.msk.f32.mxu0 %vm99_vm0, %v31_v35  ;;  %v510_v35 = vlaneseq }
  0x4a   :  { %661 = vmatmul.mubr.msk.f32.gmra.mxu0 %vm99_vm0, %v32_v36 }
  0x4b   :  { %663 = vmatprep.mubr.msk.f32.mxu0 %vm99_vm0, %v33_v37 }
  0x4e   :  { %664 = vmatmul.mubr.msk.f32.gmra.mxu0 %vm99_vm0, %v34_v38  ;;  %v511_v38 = vshrl.u32 %v510_v35, 7 }
  0x7f   :  { %v97_v42 = vpop.permute.xlu0 %96 }
  0x80   :  { %v87_v43 = vpop.permute.xlu1 %86 }
  0x88   :  { %v92_v47 = vpop.permute.xlu0 %91  ;;  %v82_v48 = vpop.permute.xlu1 %81 }
  0x8c   :  { %v77_v56 = vpop.permute.xlu0 %76  ;;  %v72_v57 = vpop.permute.xlu1 %71 }
  0x90   :  { %v67_v0 = vpop.permute.xlu0 %66  ;;  %v62_v1 = vpop.permute.xlu1 %61 }
  0x94   :  { %v311_v12 = vpop.permute.xlu0 %310  ;;  %v306_v14 = vpop.permute.xlu1 %305 }
  0x98   :  { %v301_v18 = vpop.permute.xlu0 %300  ;;  %v296_v23 = vpop.permute.xlu1 %295 }
  0x9c   :  { %v422_v30 = vpop.permute.xlu0 %421  ;;  %v427_v31 = vpop.permute.xlu1 %426 }
 0x102   :  { %v656_v40 = vpop.f32.mrf.mxu0 }
 0x103   :  { %v244_v2 = vadd.f32 %v656_v40, %v67_v0 }
 0x104   :  { %v238_v41 = vpop.f32.mrf.mxu0 }
 0x105   :  { %v239_v4 = vadd.f32 %v238_v41, %v62_v1  ;;  %v278_v6 = vmax.f32 %v244_v2, 0.0  ;;  %v512_v41 = vadd.s32 8, %v511_v38 }
 0x106   :  { %v659_v44 = vpop.f32.mrf.mxu0 }
 0x107   :  { %v254_v60 = vadd.f32 %v659_v44, %v77_v56  ;;  %v277_v7 = vmax.f32 %v239_v4, 0.0  ;;  %v513_v44 = vcvt.s32.f32 %v511_v38 }
 0x108   :  { %v248_v45 = vpop.f32.mrf.mxu0 }
 0x109   :  { %v249_v62 = vadd.f32 %v248_v45, %v72_v57  ;;  %v280_v3 = vmax.f32 %v254_v60, 0.0  ;;  %v514_v45 = vcvt.s32.f32 %v512_v41 }
 0x10a   :  { %v662_v46 = vpop.f32.mrf.mxu0 }
 0x10b   :  { %v264_v53 = vadd.f32 %v662_v46, %v87_v43  ;;  %v279_v5 = vmax.f32 %v249_v62, 0.0 }
 0x10c   :  { %v258_v49 = vpop.f32.mrf.mxu0 }
 0x10d   :  { %v259_v58 = vadd.f32 %v258_v49, %v82_v48  ;;  %v282_v61 = vmax.f32 %v264_v53, 0.0 }
 0x10e   :  { %v665_v50 = vpop.f32.mrf.mxu0 }
 0x10f   :  { %v274_v51 = vadd.f32 %v665_v50, %v97_v42  ;;  %v281_v63 = vmax.f32 %v259_v58, 0.0 }
 0x110   :  { %v268_v52 = vpop.f32.mrf.mxu0 }
 0x111   :  { %v284_v54 = vmax.f32 %v274_v51, 0.0  ;;  %v269_v55 = vadd.f32 %v268_v52, %v92_v47 }
 0x113   :  { %v283_v59 = vmax.f32 %v269_v55, 0.0  ;;  %666 = vmatprep.subr.mxu1 %v284_v54 }
 0x114   :  { %667 = vmatpush3.msra.mxu1 %v284_v54 }
 0x115   :  { %668 = vmatprep.subr.mxu1 %v283_v59 }
 0x116   :  { %669 = vmatpush3.msra.mxu1 %v283_v59 }
 0x117   :  { %670 = vmatprep.subr.mxu1 %v282_v61 }
 0x118   :  { %671 = vmatpush3.msra.mxu1 %v282_v61 }
 0x119   :  { %672 = vmatprep.subr.mxu1 %v281_v63 }
 0x11a   :  { %673 = vmatpush3.msra.mxu1 %v281_v63 }
 0x11b   :  { %674 = vmatprep.subr.mxu1 %v280_v3 }
 0x11c   :  { %675 = vmatpush3.msra.mxu1 %v280_v3 }
 0x11d   :  { %676 = vmatprep.subr.mxu1 %v279_v5 }
 0x11e   :  { %677 = vmatpush3.msra.mxu1 %v279_v5 }
 0x11f   :  { %678 = vmatprep.subr.mxu1 %v278_v6 }
 0x120   :  { %679 = vmatpush3.msra.mxu1 %v278_v6 }
 0x121   :  { %680 = vmatprep.subr.mxu1 %v277_v7 }
 0x122   :  { %681 = vmatpush3.msra.mxu1 %v277_v7 }
 0x123   :  { %683 = vmatmul.mubr.msk.f32.vlgmr.msra.gmra.mxu1 %vm313_vm1, %v286_v8 }
 0x124   :  { %685 = vmatprep.mubr.msk.f32.mxu1 %vm313_vm1, %v287_v9 }
 0x127   :  { %686 = vmatmul.mubr.msk.f32.gmra.mxu1 %vm313_vm1, %v288_v10 }
 0x128   :  { %696 = vmatprep.mubr.msk.f32.mxu1 %vm99_vm0, %v415_v11 }
 0x1e3   :  { %v684_v13 = vpop.f32.mrf.mxu1 }
 0x1e4   :  { %v398_v20 = vadd.f32 %v684_v13, %v301_v18 }
 0x1e5   :  { %v392_v15 = vpop.f32.mrf.mxu1 }
 0x1e6   :  { %v393_v24 = vadd.f32 %v392_v15, %v296_v23  ;;  %v412_v26 = vmax.f32 %v398_v20, 0.0 }
 0x1e7   :  { %v687_v16 = vpop.f32.mrf.mxu1 }
 0x1e8   :  { %v408_v17 = vadd.f32 %v687_v16, %v311_v12  ;;  %v411_v27 = vmax.f32 %v393_v24, 0.0 }
 0x1e9   :  { %v402_v19 = vpop.f32.mrf.mxu1 }
 0x1ea   :  { %v414_v21 = vmax.f32 %v408_v17, 0.0  ;;  %v403_v22 = vadd.f32 %v402_v19, %v306_v14 }
 0x1ec   :  { %v413_v25 = vmax.f32 %v403_v22, 0.0  ;;  %688 = vmatprep.subr.mxu1 %v414_v21 }
 0x1ed   :  { %689 = vmatpush3.msra.mxu1 %v414_v21 }
 0x1ee   :  { %690 = vmatprep.subr.mxu1 %v413_v25 }
 0x1ef   :  { %691 = vmatpush3.msra.mxu1 %v413_v25 }
 0x1f0   :  { %692 = vmatprep.subr.mxu1 %v412_v26 }
 0x1f1   :  { %693 = vmatpush3.msra.mxu1 %v412_v26 }
 0x1f2   :  { %694 = vmatprep.subr.mxu1 %v411_v27 }
 0x1f3   :  { %695 = vmatpush3.msra.mxu1 %v411_v27 }
 0x1f4   :  { %697 = vmatmul.mubr.msk.f32.vlgmr.msra.gmra.mxu1 %vm99_vm0, %v416_v28 }
 0x2b4   :  { %v698_v29 = vpop.f32.mrf.mxu1 }
 0x2b5   :  { %v507_v33 = vadd.f32 %v698_v29, %v427_v31 }
 0x2b6   :  { %v501_v32 = vpop.f32.mrf.mxu1 }
 0x2b7   :  { %v502_v34 = vadd.f32 %v501_v32, %v422_v30 }
 0x2b9   :  { %v515_v36 = vmax.f32 %v502_v34, %v507_v33 }
 0x2bb   :  { %v516_v37 = vrot.slane %v515_v36, 4 }
 0x2bd   :  { %v517_v39 = vmax.f32 %v515_v36, %v516_v37 }
 0x2bf   :  { %v518_v40 = vrot.slane %v517_v39, 2 }
 0x2c1   :  { %v519_v42 = vmax.f32 %v517_v39, %v518_v40 }
 0x2c3   :  { %v520_v43 = vrot.slane %v519_v42, 1 }
 0x2c5   :  { %v521_v46 = vmax.f32 %v519_v42, %v520_v43 }
 0x2c7   :  { %vm522_vm2 = vcmp.eq.f32.partialorder %v502_v34, %v521_v46  ;;  %vm523_vm3 = vcmp.eq.f32.partialorder %v507_v33, %v521_v46 }
 0x2c8   :  { %v524_v47 = vsel %vm522_vm2, %v513_v44, 16.0  ;;  %v525_v48 = vsel %vm523_vm3, %v514_v45, 16.0 }
 0x2c9   :  { %v526_v49 = vmin.f32 %v524_v47, %v525_v48 }
 0x2cb   :  { %v527_v50 = vrot.slane %v526_v49, 4 }
 0x2cd   :  { %v528_v51 = vmin.f32 %v526_v49, %v527_v50 }
 0x2cf   :  { %v529_v52 = vrot.slane %v528_v51, 2 }
 0x2d1   :  { %v530_v53 = vmin.f32 %v528_v51, %v529_v52 }
 0x2d3   :  { %v531_v54 = vrot.slane %v530_v53, 1 }
 0x2d5   :  { %v532_v55 = vmin.f32 %v530_v53, %v531_v54 }
 0x2d7   :  { %v533_v56 = vmin.f32 %v532_v55, 15.0 }
 0x2d9   :  { %v699_v57 = vtrunc.f32 %v533_v56 }
 0x2db   :  { %v700_v58 = vcvt.f32.s32 %v699_v57 }
 0x2dd   :  { %535 = vst [vmem:[#allocation2] sm:$0x1] %v700_v58 }
 0x2de   :  { %716 = shalt.err (!%p713_p4)
}
 0x2df   :  { %545 = dma.vmem_to_hbm [thread:$0]  %s543_s11, 16, %s957_s7, [#allocation3]  }
 0x2e0   :  { %725 = dma.done.wait [#allocation3], 16  }
 0x2e1   :  { %726 = vsyncadd [#allocation3], 4294967280 }
 0x2e2   :  { %549 = vsyncpa [#allocation3], 1 }

</bundles_post_ra>
